<compile_context>
chip_gen: v6e
topology: v6e:2x2x1
jax: 0.10.0
libtpu: 0.0.40
codegen_flags: <defaults>
</compile_context>

<pallas_src>
import jax
import jax.numpy as jnp
from jax.experimental import pallas as pl
from jax.experimental.pallas import tpu as pltpu


def _round_up(x: int, m: int) -> int:
    return ((x + m - 1) // m) * m


def critic_kernel(x_ref, w_ref, b_ref, o_ref):
    # x_ref: (tile_b, D) VMEM -- one batch tile of the context (pipelined)
    # w_ref: (D, 1)      VMEM -- weight column, resident across grid steps
    # b_ref: (1, 1)      SMEM -- scalar bias
    # o_ref: (tile_b, 1) VMEM -- per-row value
    acc = jnp.dot(x_ref[...], w_ref[...], preferred_element_type=jnp.float32)
    o_ref[...] = (acc + b_ref[0, 0]).astype(o_ref.dtype)


def critic_forward(context, weight, bias, *, tile_b=None):
    """context: [B, D]; weight: [1, D] (PyTorch nn.Linear layout); bias: [1]."""
    B, D = context.shape
    assert weight.shape == (1, D), weight.shape

    dtype = context.dtype
    bytes_per_elem = jnp.dtype(dtype).itemsize
    # Sublane packing: 8 rows/vreg for 32-bit, 16 for 16-bit, 32 for 8-bit.
    sublane = 8 if bytes_per_elem >= 4 else (16 if bytes_per_elem == 2 else 32)

    # Pad B only to the sublane multiple (keeps the BlockSpec legal without
    # streaming whole junk tiles from HBM).
    b_pad = _round_up(B, sublane)

    if tile_b is None:
        # Byte-budgeted tile: ~6 MiB per buffer -> 12 MiB double-buffered for
        # the context stream, safely inside the default scoped VMEM on all
        # generations (16 MiB v5e, 32 MiB v6e/v7x) for any D, while being
        # large enough that per-grid-step overhead is negligible vs HBM time.
        budget_per_buffer = 6 * 1024 * 1024
        rows = budget_per_buffer // (bytes_per_elem * D)
        tile_b = max(sublane, (rows // sublane) * sublane)
        # Keep >=2 grid steps for big batches so v7x's two TensorCores both
        # get work (harmless on single-TC v5e/v6e).
        if b_pad >= 4096 and tile_b >= b_pad:
            tile_b = _round_up(pl.cdiv(b_pad, 2), sublane)
    tile_b = _round_up(min(tile_b, b_pad), sublane)

    num_tiles = pl.cdiv(b_pad, tile_b)  # edge block masked by Pallas

    x = context if b_pad == B else jnp.pad(context, ((0, b_pad - B), (0, 0)))
    # Weight as an MXU-friendly (D, 1) column, in the context dtype so a bf16
    # context feeds the MXU with no in-kernel cast.
    w_col = weight.reshape(D, 1).astype(dtype)
    b_smem = bias.reshape(1, 1).astype(jnp.float32)

    out = pl.pallas_call(
        critic_kernel,
        out_shape=jax.ShapeDtypeStruct((b_pad, 1), dtype),
        grid_spec=pltpu.PrefetchScalarGridSpec(
            num_scalar_prefetch=0,
            grid=(num_tiles,),
            in_specs=[
                # context: one (tile_b, D) block per grid step (pipelined).
                pl.BlockSpec((tile_b, D), lambda i: (i, 0)),
                # weight: same block every step -> stays resident in VMEM.
                pl.BlockSpec((D, 1), lambda i: (0, 0)),
                # bias: scalar in SMEM.
                pl.BlockSpec(memory_space=pltpu.SMEM),
            ],
            out_specs=pl.BlockSpec((tile_b, 1), lambda i: (i, 0)),
        ),
        compiler_params=pltpu.CompilerParams(
            # Batch tiles are independent -> shard across v7x's 2 TensorCores.
            dimension_semantics=("parallel",),
        ),
        cost_estimate=pl.CostEstimate(
            flops=2 * b_pad * D,
            transcendentals=0,
            bytes_accessed=bytes_per_elem * (b_pad * D + D + b_pad) + 4,
        ),
    )(x, w_col, b_smem)

    return out[:B] if b_pad != B else out


def critic_forward_reference(context, weight, bias):
    """Plain-JAX reference (also the better choice for genuinely tiny batches)."""
    return context @ weight.T + bias


def init_critic_params(key, context_dim):
    """Deterministic synthetic init matching nn.Linear(context_dim, 1) shapes."""
    # TODO(synk): the reference repo's weights_init (orthogonal init) is a
    # parameter-initialization detail, not part of the forward pass.
    kw, kb = jax.random.split(key)
    bound = 1.0 / jnp.sqrt(context_dim)
    weight = jax.random.uniform(kw, (1, context_dim), jnp.float32, -bound, bound)
    bias = jax.random.uniform(kb, (1,), jnp.float32, -bound, bound)
    return weight, bias


if __name__ == "__main__":
    key = jax.random.PRNGKey(0)
    k_x, k_p = jax.random.split(key)

    context_dim = 128
    B = 37  # deliberately not 8-aligned: exercises the sublane-pad path
    context = jax.random.normal(k_x, (B, context_dim), jnp.float32)
    weight, bias = init_critic_params(k_p, context_dim)

    ref = critic_forward_reference(context, weight, bias)

    # Default (byte-budgeted) tiling: single tile covers this small batch.
    value = jax.block_until_ready(critic_forward(context, weight, bias))
    assert value.shape == (B, 1)
    assert jnp.allclose(value, ref, atol=1e-4, rtol=1e-4)

    # Forced small tile: cdiv grid with a partial (masked) edge block plus
    # the sublane-padded tail, exercising the pipelined multi-tile path and
    # the VMEM-resident weight BlockSpec.
    value2 = jax.block_until_ready(
        critic_forward(context, weight, bias, tile_b=16)
    )
    assert value2.shape == (B, 1)
    assert jnp.allclose(value2, ref, atol=1e-4, rtol=1e-4)

    print("KERNEL_OK")
</pallas_src>

<mosaic_0001>
module attributes {stable_mosaic.version = 11 : i64} {
  func.func @critic_kernel(%arg0: i32, %arg1: memref<40x128xf32, #tpu.memory_space<vmem>>, %arg2: memref<128x1xf32, #tpu.memory_space<vmem>>, %arg3: memref<1x1xf32, #tpu.memory_space<smem>>, %arg4: memref<40x1xf32, #tpu.memory_space<vmem>>) attributes {dimension_semantics = [#tpu.dimension_semantics<parallel>], iteration_bounds = array<i64: 1>, scalar_prefetch = 0 : i64, scratch_operands = 0 : i64, tpu.core_type = #tpu.core_type<tc>, window_params = [{transform_indices = @transform_0, window_bounds = array<i64: 40, 128>}, {pipeline_mode = #tpu.pipeline_mode<synchronous>, transform_indices = @transform_1, window_bounds = array<i64: 128, 1>}, {transform_indices = @transform_2, window_bounds = array<i64: 1, 1>}, {transform_indices = @transform_3, window_bounds = array<i64: 40, 1>}]} {
    %c0 = arith.constant 0 : index
    %c0_0 = arith.constant 0 : index
    %0 = vector.load %arg1[%c0, %c0_0] : memref<40x128xf32, #tpu.memory_space<vmem>>, vector<40x128xf32>
    %c0_1 = arith.constant 0 : index
    %c0_2 = arith.constant 0 : index
    %1 = vector.load %arg2[%c0_1, %c0_2] : memref<128x1xf32, #tpu.memory_space<vmem>>, vector<128x1xf32>
    %cst = arith.constant dense<0.000000e+00> : vector<40x1xf32>
    %2 = tpu.matmul %0, %1, %cst {dimension_numbers = #tpu.dot_dimension_numbers<[1], [0], [0], [1], [0, 0, 1, 1], [], []>} : vector<40x128xf32>, vector<128x1xf32>, vector<40x1xf32> -> vector<40x1xf32>
    %c0_3 = arith.constant 0 : index
    %c0_4 = arith.constant 0 : index
    %3 = memref.load %arg3[%c0_3, %c0_4] : memref<1x1xf32, #tpu.memory_space<smem>>
    %4 = vector.broadcast %3 : f32 to vector<40x1xf32>
    %5 = arith.addf %2, %4 : vector<40x1xf32>
    %c0_5 = arith.constant 0 : index
    %c0_6 = arith.constant 0 : index
    %6 = vector.load %arg4[%c0_5, %c0_6] : memref<40x1xf32, #tpu.memory_space<vmem>>, vector<40x1xf32>
    tpu.vector_store %arg4[%c0_5, %c0_6], %5 {strides = array<i32>} : memref<40x1xf32, #tpu.memory_space<vmem>>, vector<40x1xf32>,
    return
  }
  func.func @transform_0(%arg0: i32) -> (i32, i32) {
    %c0_i32 = arith.constant 0 : i32
    %c0_i32_0 = arith.constant 0 : i32
    return %arg0, %c0_i32 : i32, i32
  }
  func.func @transform_1(%arg0: i32) -> (i32, i32) {
    %c0_i32 = arith.constant 0 : i32
    %c0_i32_0 = arith.constant 0 : i32
    %c0_i32_1 = arith.constant 0 : i32
    return %c0_i32, %c0_i32_0 : i32, i32
  }
  func.func @transform_2(%arg0: i32) -> (i32, i32) {
    %c0_i32 = arith.constant 0 : i32
    %c0_i32_0 = arith.constant 0 : i32
    %c0_i32_1 = arith.constant 0 : i32
    return %c0_i32, %c0_i32_0 : i32, i32
  }
  func.func @transform_3(%arg0: i32) -> (i32, i32) {
    %c0_i32 = arith.constant 0 : i32
    %c0_i32_0 = arith.constant 0 : i32
    return %arg0, %c0_i32 : i32, i32
  }
}

</mosaic_0001>

<bundles_post_ra>
// kernel: tpu_custom_call.1
= control target key start
LH: loop header
LB: loop body
LE: loop exit
PB: predicated region body
PF: predicated region fallthrough
CT: control target
= control target key end

     0   :  { %v240_v0 = vmov 0.0   ;;  %vm241_vm0 = vmmov 0   ;;  %vm128_vm1 = vcmask 7168   ;;  %s385_s1 = inlined_call_operand.vmem [shape: f32[128,1], index: 1, kind: input, shape index: {}]   ;;  %s386_s0 = inlined_call_operand.vmem [shape: f32[40,128], index: 0, kind: input, shape index: {}]   ;;  %s387_s2 = inlined_call_operand.<no memory space> [shape: f32[1,1], index: 2, kind: input, shape index: {}]   ;;  %s388_s3 = inlined_call_operand.vmem [shape: f32[40,1], index: 3, kind: output, shape index: {}]  }
   0x1   :  { %159 = vmatprep.subr.mxu0 %v240_v0  ;;  %v35_v1 = vld [vmem:[%s385_s1 + $0x78] sm:$0xff]  ;;  %206 = vmatprep.subr.mxu1 %v240_v0  ;;  %v34_v2 = vld [vmem:[%s385_s1 + $0x70] sm:$0xff]  ;;  %v33_v3 = vld [vmem:[%s385_s1 + $0x68] sm:$0xff]  ;;  %v37_v22 = vstv %s387_s2 }
   0x2   :  { %160 = vmatpush3.msra.mxu0 %v35_v1  ;;  %222 = vmatpush3.msra.mxu1 %v35_v1  ;;  %v32_v4 = vld [vmem:[%s385_s1 + $0x60] sm:$0xff]  ;;  %v31_v5 = vld [vmem:[%s385_s1 + $0x58] sm:$0xff]  ;;  %v30_v6 = vld [vmem:[%s385_s1 + $0x50] sm:$0xff] }
   0x3   :  { %161 = vmatprep.subr.mxu0 %v240_v0  ;;  %207 = vmatprep.subr.mxu1 %v240_v0  ;;  %v29_v7 = vld [vmem:[%s385_s1 + $0x48] sm:$0xff]  ;;  %v28_v8 = vld [vmem:[%s385_s1 + $0x40] sm:$0xff]  ;;  %v27_v9 = vld [vmem:[%s385_s1 + $0x38] sm:$0xff] }
   0x4   :  { %162 = vmatpush3.msra.mxu0 %v34_v2  ;;  %223 = vmatpush3.msra.mxu1 %v34_v2  ;;  %v26_v10 = vld [vmem:[%s385_s1 + $0x30] sm:$0xff]  ;;  %v25_v11 = vld [vmem:[%s385_s1 + $0x28] sm:$0xff]  ;;  %v24_v12 = vld [vmem:[%s385_s1 + $0x20] sm:$0xff] }
   0x5   :  { %163 = vmatprep.subr.mxu0 %v240_v0  ;;  %208 = vmatprep.subr.mxu1 %v240_v0  ;;  %v23_v13 = vld [vmem:[%s385_s1 + $0x18] sm:$0xff]  ;;  %v22_v14 = vld [vmem:[%s385_s1 + $0x10] sm:$0xff]  ;;  %v21_v15 = vld [vmem:[%s385_s1 + $0x8] sm:$0xff] }
   0x6   :  { %164 = vmatpush3.msra.mxu0 %v33_v3  ;;  %224 = vmatpush3.msra.mxu1 %v33_v3  ;;  %v20_v16 = vld [vmem:[%s385_s1] sm:$0xff]  ;;  %v18_v18 = vld [vmem:[%s386_s0 + $0x18] sm:$0xff]  ;;  %v16_v19 = vld [vmem:[%s386_s0 + $0x8] sm:$0xff] }
   0x7   :  { %165 = vmatprep.subr.mxu0 %v240_v0  ;;  %209 = vmatprep.subr.mxu1 %v240_v0  ;;  %v15_v17 = vld [vmem:[%s386_s0] sm:$0xff]  ;;  %v17_v21 = vld [vmem:[%s386_s0 + $0x10] sm:$0xff] }
   0x8   :  { %166 = vmatpush3.msra.mxu0 %v32_v4  ;;  %225 = vmatpush3.msra.mxu1 %v32_v4  ;;  %v19_v20 = vld [vmem:[%s386_s0 + $0x20] sm:$0xff] }
   0x9   :  { %167 = vmatprep.subr.mxu0 %v240_v0  ;;  %210 = vmatprep.subr.mxu1 %v240_v0 }
   0xa   :  { %168 = vmatpush3.msra.mxu0 %v31_v5  ;;  %226 = vmatpush3.msra.mxu1 %v31_v5 }
   0xb   :  { %169 = vmatprep.subr.mxu0 %v240_v0  ;;  %211 = vmatprep.subr.mxu1 %v240_v0 }
   0xc   :  { %170 = vmatpush3.msra.mxu0 %v30_v6  ;;  %227 = vmatpush3.msra.mxu1 %v30_v6 }
   0xd   :  { %171 = vmatprep.subr.mxu0 %v240_v0  ;;  %212 = vmatprep.subr.mxu1 %v240_v0 }
   0xe   :  { %172 = vmatpush3.msra.mxu0 %v29_v7  ;;  %228 = vmatpush3.msra.mxu1 %v29_v7 }
   0xf   :  { %173 = vmatprep.subr.mxu0 %v240_v0  ;;  %213 = vmatprep.subr.mxu1 %v240_v0 }
  0x10   :  { %174 = vmatpush3.msra.mxu0 %v28_v8  ;;  %229 = vmatpush3.msra.mxu1 %v28_v8 }
  0x11   :  { %175 = vmatprep.subr.mxu0 %v240_v0  ;;  %214 = vmatprep.subr.mxu1 %v240_v0 }
  0x12   :  { %176 = vmatpush3.msra.mxu0 %v27_v9  ;;  %230 = vmatpush3.msra.mxu1 %v27_v9 }
  0x13   :  { %177 = vmatprep.subr.mxu0 %v240_v0  ;;  %215 = vmatprep.subr.mxu1 %v240_v0 }
  0x14   :  { %178 = vmatpush3.msra.mxu0 %v26_v10  ;;  %231 = vmatpush3.msra.mxu1 %v26_v10 }
  0x15   :  { %179 = vmatprep.subr.mxu0 %v240_v0  ;;  %216 = vmatprep.subr.mxu1 %v240_v0 }
  0x16   :  { %180 = vmatpush3.msra.mxu0 %v25_v11  ;;  %232 = vmatpush3.msra.mxu1 %v25_v11 }
  0x17   :  { %181 = vmatprep.subr.mxu0 %v240_v0  ;;  %217 = vmatprep.subr.mxu1 %v240_v0 }
  0x18   :  { %182 = vmatpush3.msra.mxu0 %v24_v12  ;;  %233 = vmatpush3.msra.mxu1 %v24_v12 }
  0x19   :  { %183 = vmatprep.subr.mxu0 %v240_v0  ;;  %218 = vmatprep.subr.mxu1 %v240_v0 }
  0x1a   :  { %184 = vmatpush3.msra.mxu0 %v23_v13  ;;  %234 = vmatpush3.msra.mxu1 %v23_v13 }
  0x1b   :  { %185 = vmatprep.subr.mxu0 %v240_v0  ;;  %219 = vmatprep.subr.mxu1 %v240_v0 }
  0x1c   :  { %186 = vmatpush3.msra.mxu0 %v22_v14  ;;  %235 = vmatpush3.msra.mxu1 %v22_v14 }
  0x1d   :  { %187 = vmatprep.subr.mxu0 %v240_v0  ;;  %220 = vmatprep.subr.mxu1 %v240_v0 }
  0x1e   :  { %188 = vmatpush3.msra.mxu0 %v21_v15  ;;  %236 = vmatpush3.msra.mxu1 %v21_v15 }
  0x1f   :  { %189 = vmatprep.subr.mxu0 %v240_v0  ;;  %191 = vmatprep.mubr.msk.f32.mxu0 %vm241_vm0, %v240_v0 }
  0x20   :  { %190 = vmatpush3.msra.mxu0 %v20_v16  ;;  %221 = vmatprep.subr.mxu1 %v240_v0 }
  0x21   :  { %192 = vmatmul.mubr.f32.vlgmr.msra.gmra.mxu0 %v15_v17  ;;  %237 = vmatpush3.msra.mxu1 %v20_v16 }
  0x22   :  { %200 = vmatprep.mubr.msk.f32.mxu1 %vm241_vm0, %v240_v0  ;;  %194 = vmatprep.mubr.msk.f32.mxu0 %vm241_vm0, %v240_v0 }
  0x23   :  { %201 = vmatmul.mubr.f32.vlgmr.msra.gmra.mxu1 %v18_v18 }
  0x24   :  { %203 = vmatprep.mubr.msk.f32.mxu1 %vm241_vm0, %v240_v0 }
  0x25   :  { %195 = vmatmul.mubr.f32.gmra.mxu0 %v16_v19 }
  0x26   :  { %197 = vmatprep.mubr.msk.f32.mxu0 %vm241_vm0, %v240_v0 }
  0x27   :  { %204 = vmatmul.mubr.f32.gmra.mxu1 %v19_v20 }
  0x29   :  { %198 = vmatmul.mubr.f32.gmra.mxu0 %v17_v21 }
  0xe1   :  { %v104_v23 = vpop.f32.mrf.mxu0 }
  0xe2   :  { %v105_v24 = vadd.f32 %v104_v23, %v37_v22 }
  0xe3   :  { %v193_v25 = vpop.f32.mrf.mxu0  ;;  %v119_v26 = vpop.f32.mrf.mxu1 }
  0xe4   :  { %129 = vst.msk [vmem:[%s388_s3] sm:$0xff] %vm128_vm1, %v105_v24  ;;  %v120_v27 = vadd.f32 %v119_v26, %v37_v22 }
  0xe5   :  { %v109_v28 = vpop.f32.mrf.mxu0  ;;  %v202_v29 = vpop.f32.mrf.mxu1 }
  0xe6   :  { %132 = vst.msk [vmem:[%s388_s3 + $0x18] sm:$0xff] %vm128_vm1, %v120_v27  ;;  %v110_v30 = vadd.f32 %v109_v28, %v37_v22 }
  0xe7   :  { %v196_v31 = vpop.f32.mrf.mxu0  ;;  %v124_v32 = vpop.f32.mrf.mxu1 }
  0xe8   :  { %130 = vst.msk [vmem:[%s388_s3 + $0x8] sm:$0xff] %vm128_vm1, %v110_v30  ;;  %v125_v33 = vadd.f32 %v124_v32, %v37_v22 }
  0xe9   :  { %v114_v34 = vpop.f32.mrf.mxu0  ;;  %v205_v35 = vpop.f32.mrf.mxu1 }
  0xea   :  { %133 = vst.msk [vmem:[%s388_s3 + $0x20] sm:$0xff] %vm128_vm1, %v125_v33  ;;  %v115_v36 = vadd.f32 %v114_v34, %v37_v22 }
  0xeb   :  { %v199_v37 = vpop.f32.mrf.mxu0 }
  0xec   :  { %131 = vst.msk [vmem:[%s388_s3 + $0x10] sm:$0xff] %vm128_vm1, %v115_v36 }

</bundles_post_ra>
